<compile_context>
chip_gen: v6e
topology: v6e:2x2x1
jax: 0.10.0
libtpu: 0.0.40
codegen_flags: <defaults>
</compile_context>

<pallas_src>
import jax
import jax.numpy as jnp
from jax.experimental import pallas as pl
from jax.experimental.pallas import tpu as pltpu


LANE = 128     # lane width: pad all feature dims to a multiple of this
SUBLANE = 8    # sublane width: pad batch to a multiple of this


# ------------------------------ helpers ----------------------------------- #
def _cdiv(a, b):
    return -(-a // b)


def _round_up(n, m):
    return _cdiv(n, m) * m


def _pad_axis(a, axis, target):
    pad = target - a.shape[axis]
    if pad <= 0:
        return a
    widths = [(0, 0)] * a.ndim
    widths[axis] = (0, pad)
    return jnp.pad(a, widths)


def _vmem_capacity_bytes():
    """Physical VMEM per TensorCore; conservative fallback if unqueryable."""
    try:
        info = pltpu.get_tpu_info()
        cap = getattr(info, "vmem_capacity_bytes", None)
        if cap:
            return int(cap)
    except Exception:
        pass
    return 64 * 1024 * 1024   # v7x per-TC size: safe lower bound everywhere


def _pad_inputs(x, params, tm, mxu_dtype):
    """Zero-pad batch / feature dims so everything is (8,128)-tile friendly.

    Zero padding is math-preserving for Linear+ReLU chains: padded input
    columns hit zero weight rows, padded hidden/output columns get
    relu(0 + 0) = 0 and contribute nothing downstream.  Padded batch rows are
    sliced off after the kernel.
    """
    n = x.shape[0]
    d_out = params[-1][0].shape[1]

    xp = _pad_axis(x, 1, _round_up(x.shape[1], LANE))
    if mxu_dtype is not None:
        xp = xp.astype(mxu_dtype)

    padded = []
    for (w, b) in params:
        w = jnp.asarray(w)
        wp = _pad_axis(_pad_axis(w, 0, _round_up(w.shape[0], LANE)),
                       1, _round_up(w.shape[1], LANE))
        if mxu_dtype is not None:
            wp = wp.astype(mxu_dtype)
        bp = _pad_axis(jnp.asarray(b, jnp.float32).reshape(1, -1),
                       1, _round_up(jnp.asarray(b).size, LANE))
        padded.append((wp, bp))

    # Small-VMEM chips (v7x, 64 MiB): cap the M tile for wide f32 features.
    max_feat = max([xp.shape[1]] + [wp.shape[1] for wp, _ in padded])
    if (mxu_dtype is None and max_feat > 2048
            and _vmem_capacity_bytes() <= 64 * 1024 * 1024):
        tm = min(tm, 256)
    tm = max(SUBLANE, _round_up(tm, SUBLANE))

    # Batch tiling: >=2 M-tiles when the batch allows it (megacore sharding on
    # v7x), minimal last-tile padding waste (< 8 rows per tile).
    n8 = _round_up(max(n, 1), SUBLANE)
    n_tiles = max(1, _cdiv(n8, tm))
    if n8 >= 2 * SUBLANE:
        n_tiles = max(n_tiles, 2)
    tm_eff = _round_up(_cdiv(n8, n_tiles), SUBLANE)
    n_tiles = _cdiv(n8, tm_eff)
    n_pad = n_tiles * tm_eff
    xp = _pad_axis(xp, 0, n_pad)

    d_out_p = padded[-1][1].shape[1]
    return xp, padded, n, n_pad, tm_eff, d_out, d_out_p


def _flatten_params(pparams):
    flat = []
    for (wp, bp) in pparams:
        flat += [wp, bp]
    return flat


def _weight_specs(pparams, single_buffer):
    """BlockSpecs for all (w, b): full blocks, constant index_map, and (when
    supported) single-buffered so constant blocks don't double their VMEM."""
    specs = []
    for (wp, bp) in pparams:
        for arr in (wp, bp):
            if single_buffer:
                specs.append(pl.BlockSpec(arr.shape, lambda *_: (0, 0),
                                          pipeline_mode=pl.Buffered(1)))
            else:
                specs.append(pl.BlockSpec(arr.shape, lambda *_: (0, 0)))
    return specs


def _vmem_limit_bytes(xp, pparams, tm_eff, d_out_p, out_dtype,
                      extra_scratch_bytes=0, weight_bufs=1):
    """Computed VMEM guard-rail: tiles + resident weights + slack, clamped to
    75% of physical VMEM (generation-aware: ~48 MiB on v7x, ~96 MiB v5e/v6e)."""
    est = 2 * tm_eff * xp.shape[1] * xp.dtype.itemsize               # x tile x2
    est += 2 * tm_eff * d_out_p * jnp.dtype(out_dtype).itemsize      # out tile x2
    for (wp, bp) in pparams:
        est += weight_bufs * (wp.size * wp.dtype.itemsize
                              + bp.size * bp.dtype.itemsize)         # resident
        est += tm_eff * wp.shape[1] * 4                              # f32 act temp
    est += extra_scratch_bytes
    est = int(est * 1.5) + (2 << 20)                                 # slack
    cap = (_vmem_capacity_bytes() * 3) // 4
    return max(min(est, cap), min(32 * 1024 * 1024, cap))


def _cost_estimate(xp, pparams, d_out_p, out_dtype, compute_rows, out_rows):
    flops = sum(2 * compute_rows * wp.shape[0] * wp.shape[1]
                for wp, _ in pparams)
    bytes_accessed = xp.size * xp.dtype.itemsize
    bytes_accessed += sum(wp.size * wp.dtype.itemsize
                          + bp.size * bp.dtype.itemsize
                          for wp, bp in pparams)
    bytes_accessed += out_rows * d_out_p * jnp.dtype(out_dtype).itemsize
    return pl.CostEstimate(flops=int(flops), transcendentals=0,
                           bytes_accessed=int(bytes_accessed))


def _call_with_weight_fallback(build, xp, flat):
    """Prefer single-buffered constant weights (pl.Buffered(1)); fall back to
    default buffering if the installed Pallas rejects buffer_count=1."""
    try:
        return build(True)(xp, *flat)
    except Exception:           # pragma: no cover - compatibility fallback
        return build(False)(xp, *flat)


def _maybe_unpad(out, n, n_pad, d_out, d_out_p):
    if n == n_pad and d_out == d_out_p:
        return out              # fast path: no extra HBM pass
    return out[:n, :d_out]


# ----------------------------- Pallas kernels ------------------------------ #
def _make_fused_kernel(n_stages, scale=1):
    """x -> [Linear+ReLU] * n_stages (-> * scale) -> out, entirely in VMEM."""
    def kernel(*refs):
        x_ref = refs[0]
        o_ref = refs[1 + 2 * n_stages]
        h = x_ref[...]
        for s in range(n_stages):
            w = refs[1 + 2 * s][...]
            b = refs[2 + 2 * s][...]
            h = jnp.maximum(
                jnp.dot(h.astype(w.dtype), w,
                        preferred_element_type=jnp.float32) + b, 0.0)
        if scale != 1:
            h = h * jnp.float32(scale)
        o_ref[...] = h.astype(o_ref.dtype)
    return kernel


def _make_const_tile_kernel(n_stages, ):
    """constant_forward(reduce=False), stateless: compute once per M tile
    (t == 0) into a resident VMEM scratch, replicate into the T output slots."""
    def kernel(*refs):
        x_ref = refs[0]
        o_ref = refs[1 + 2 * n_stages]
        res_ref = refs[2 + 2 * n_stages]
        t = pl.program_id(1)

        @pl.when(t == 0)
        def _compute():
            h = x_ref[...]
            for s in range(n_stages):
                w = refs[1 + 2 * s][...]
                b = refs[2 + 2 * s][...]
                h = jnp.maximum(
                    jnp.dot(h.astype(w.dtype), w,
                            preferred_element_type=jnp.float32) + b, 0.0)
            res_ref[...] = h.astype(res_ref.dtype)

        o_ref[...] = res_ref[...]
    return kernel


def _make_const_reduce_kernel(n_stages, acc_in_out):
    """constant_forward(reduce=True) stateful-safe fallback: T on grid axis 1,
    summed into a resident block (o_ref itself when the out dtype is f32)."""
    def kernel(*refs):
        x_ref = refs[0]
        o_ref = refs[1 + 2 * n_stages]
        acc_ref = o_ref if acc_in_out else refs[2 + 2 * n_stages]
        t = pl.program_id(1)

        @pl.when(t == 0)
        def _init():
            acc_ref[...] = jnp.zeros_like(acc_ref)

        h = x_ref[...]
        for s in range(n_stages):
            w = refs[1 + 2 * s][...]
            b = refs[2 + 2 * s][...]
            h = jnp.maximum(
                jnp.dot(h.astype(w.dtype), w,
                        preferred_element_type=jnp.float32) + b, 0.0)
        acc_ref[...] += h.astype(acc_ref.dtype)

        if not acc_in_out:
            @pl.when(t == pl.num_programs(1) - 1)
            def _fin():
                o_ref[...] = acc_ref[...].astype(o_ref.dtype)
    return kernel


# ------------------------------ wrappers ----------------------------------- #
def fused_pipeline_forward(x, params, *, tm=512, mxu_dtype=None):
    """ReLU(...ReLU(x @ W1 + b1)... @ WS + bS) in one pallas_call."""
    xp, pparams, n, n_pad, tm_eff, d_out, d_out_p = _pad_inputs(
        x, params, tm, mxu_dtype)
    n_stages = len(params)
    n_tiles = n_pad // tm_eff
    flat = _flatten_params(pparams)
    out_dtype = x.dtype
    vmem = _vmem_limit_bytes(xp, pparams, tm_eff, d_out_p, out_dtype)
    cost = _cost_estimate(xp, pparams, d_out_p, out_dtype, n_pad, n_pad)

    def build(single_buffer):
        in_specs = ([pl.BlockSpec((tm_eff, xp.shape[1]), lambda i: (i, 0))]
                    + _weight_specs(pparams, single_buffer))
        return pl.pallas_call(
            _make_fused_kernel(n_stages),
            out_shape=jax.ShapeDtypeStruct((n_pad, d_out_p), out_dtype),
            grid=(n_tiles,),
            in_specs=in_specs,
            out_specs=pl.BlockSpec((tm_eff, d_out_p), lambda i: (i, 0)),
            compiler_params=pltpu.CompilerParams(
                dimension_semantics=("parallel",),
                vmem_limit_bytes=vmem),
            cost_estimate=cost,
        )

    out = _call_with_weight_fallback(build, xp, flat)
    return _maybe_unpad(out, n, n_pad, d_out, d_out_p)


def fused_constant_forward(x, params, T, *, reduce=True, tm=512,
                           mxu_dtype=None, stateless=True):
    """Run the pipeline "T times" on constant x in ONE pallas_call.

    stateless=True (default): Linear+ReLU stages are pure functions of x, so
    the pipeline is evaluated once per M tile; reduce=True scales by T inside
    the kernel, reduce=False replicates the result into the T output slots.
    stateless=False: genuinely evaluate T passes (for future stateful stages).
    """
    xp, pparams, n, n_pad, tm_eff, d_out, d_out_p = _pad_inputs(
        x, params, tm, mxu_dtype)
    n_stages = len(params)
    n_tiles = n_pad // tm_eff
    flat = _flatten_params(pparams)
    out_dtype = x.dtype

    if reduce and stateless:
        # One pass, scaled by T inside the kernel (exact for pure stages).
        vmem = _vmem_limit_bytes(xp, pparams, tm_eff, d_out_p, out_dtype)
        cost = _cost_estimate(xp, pparams, d_out_p, out_dtype, n_pad, n_pad)

        def build(single_buffer):
            in_specs = ([pl.BlockSpec((tm_eff, xp.shape[1]), lambda i: (i, 0))]
                        + _weight_specs(pparams, single_buffer))
            return pl.pallas_call(
                _make_fused_kernel(n_stages, scale=T),
                out_shape=jax.ShapeDtypeStruct((n_pad, d_out_p), out_dtype),
                grid=(n_tiles,),
                in_specs=in_specs,
                out_specs=pl.BlockSpec((tm_eff, d_out_p), lambda i: (i, 0)),
                compiler_params=pltpu.CompilerParams(
                    dimension_semantics=("parallel",),
                    vmem_limit_bytes=vmem),
                cost_estimate=cost,
            )

        out = _call_with_weight_fallback(build, xp, flat)
        return _maybe_unpad(out, n, n_pad, d_out, d_out_p)

    if (not reduce) and stateless:
        # One pass per M tile, replicated into T output blocks from VMEM.
        scratch_bytes = tm_eff * d_out_p * jnp.dtype(out_dtype).itemsize
        vmem = _vmem_limit_bytes(xp, pparams, tm_eff, d_out_p, out_dtype,
                                 extra_scratch_bytes=scratch_bytes)
        cost = _cost_estimate(xp, pparams, d_out_p, out_dtype,
                              n_pad, T * n_pad)

        def build(single_buffer):
            in_specs = ([pl.BlockSpec((tm_eff, xp.shape[1]),
                                      lambda i, t: (i, 0))]
                        + _weight_specs(pparams, single_buffer))
            return pl.pallas_call(
                _make_const_tile_kernel(n_stages),
                out_shape=jax.ShapeDtypeStruct((T * n_pad, d_out_p), out_dtype),
                grid=(n_tiles, T),
                in_specs=in_specs,
                out_specs=pl.BlockSpec((tm_eff, d_out_p),
                                       lambda i, t: (t * n_tiles + i, 0)),
                scratch_shapes=[pltpu.VMEM((tm_eff, d_out_p), out_dtype)],
                compiler_params=pltpu.CompilerParams(
                    dimension_semantics=("parallel", "arbitrary"),
                    vmem_limit_bytes=vmem),
                cost_estimate=cost,
            )

        out = _call_with_weight_fallback(build, xp, flat)
        if n == n_pad and d_out == d_out_p:
            return out
        out = out.reshape(T, n_pad, d_out_p)[:, :n, :d_out]
        return out.reshape(T * n, d_out)

    if reduce:
        # Stateful-safe fallback: T genuine passes, summed into a resident
        # block (directly into o_ref when the output dtype is already f32).
        acc_in_out = jnp.dtype(out_dtype) == jnp.dtype(jnp.float32)
        scratch = [] if acc_in_out else [pltpu.VMEM((tm_eff, d_out_p),
                                                    jnp.float32)]
        scratch_bytes = 0 if acc_in_out else tm_eff * d_out_p * 4
        vmem = _vmem_limit_bytes(xp, pparams, tm_eff, d_out_p, out_dtype,
                                 extra_scratch_bytes=scratch_bytes)
        cost = _cost_estimate(xp, pparams, d_out_p, out_dtype,
                              T * n_pad, n_pad)

        def build(single_buffer):
            in_specs = ([pl.BlockSpec((tm_eff, xp.shape[1]),
                                      lambda i, t: (i, 0))]
                        + _weight_specs(pparams, single_buffer))
            return pl.pallas_call(
                _make_const_reduce_kernel(n_stages, acc_in_out),
                out_shape=jax.ShapeDtypeStruct((n_pad, d_out_p), out_dtype),
                grid=(n_tiles, T),
                in_specs=in_specs,
                out_specs=pl.BlockSpec((tm_eff, d_out_p),
                                       lambda i, t: (i, 0)),
                scratch_shapes=scratch,
                compiler_params=pltpu.CompilerParams(
                    dimension_semantics=("parallel", "arbitrary"),
                    vmem_limit_bytes=vmem),
                cost_estimate=cost,
            )

        out = _call_with_weight_fallback(build, xp, flat)
        return _maybe_unpad(out, n, n_pad, d_out, d_out_p)

    # reduce=False, stateless=False: T genuine passes, concatenated.
    vmem = _vmem_limit_bytes(xp, pparams, tm_eff, d_out_p, out_dtype)
    cost = _cost_estimate(xp, pparams, d_out_p, out_dtype,
                          T * n_pad, T * n_pad)

    def build(single_buffer):
        in_specs = ([pl.BlockSpec((tm_eff, xp.shape[1]),
                                  lambda i, t: (i, 0))]
                    + _weight_specs(pparams, single_buffer))
        return pl.pallas_call(
            _make_fused_kernel(n_stages),
            out_shape=jax.ShapeDtypeStruct((T * n_pad, d_out_p), out_dtype),
            grid=(n_tiles, T),
            in_specs=in_specs,
            out_specs=pl.BlockSpec((tm_eff, d_out_p),
                                   lambda i, t: (t * n_tiles + i, 0)),
            compiler_params=pltpu.CompilerParams(
                dimension_semantics=("parallel", "arbitrary"),
                vmem_limit_bytes=vmem),
            cost_estimate=cost,
        )

    out = _call_with_weight_fallback(build, xp, flat)
    if n == n_pad and d_out == d_out_p:
        return out
    out = out.reshape(T, n_pad, d_out_p)[:, :n, :d_out]
    return out.reshape(T * n, d_out)


# --------------------------- ModelPipeline port ---------------------------- #
class ModelPipelinePallas:
    """JAX/Pallas port of SpikingFlow.softbp.ModelPipeline.

    Stages are Linear+ReLU blocks given by (W, b) pairs (y = relu(x @ W + b)).
    All appended stages are fused into a single Pallas kernel per call; the
    original chunk/x_pos scheduling is a multi-GPU overlap trick with no
    single-TensorCore benefit, so it is elided (the math is identical;
    split_sizes is only checked for divisibility, as in the original).

    mxu_dtype=jnp.bfloat16 runs the matmuls on the bf16-native MXU path with
    f32 accumulation (2-4x MXU throughput, half the weight VMEM / DMA bytes);
    expect bf16-level deviation (~1e-2) from the f32 reference.
    """

    def __init__(self):
        self.params = []        # list of (W [d_in,d_out], b [d_out]) pairs
        self.gpu_list = []      # kept for structural parity; unused on TPU

    def append(self, w, b, gpu_id="0"):
        self.params.append((jnp.asarray(w), jnp.asarray(b)))
        self.gpu_list.append("tpu:" + gpu_id)

    def forward(self, x, split_sizes, *, mxu_dtype=None):
        assert x.shape[0] % split_sizes == 0, \
            "x.shape[0] not divisible by split_sizes"
        return fused_pipeline_forward(x, self.params, mxu_dtype=mxu_dtype)

    def constant_forward(self, x, T, reduce=True, *, mxu_dtype=None,
                         stateless=True):
        return fused_constant_forward(x, self.params, T, reduce=reduce,
                                      mxu_dtype=mxu_dtype,
                                      stateless=stateless)


# ---------------------------------- main ----------------------------------- #
if __name__ == "__main__":
    key = jax.random.PRNGKey(0)
    kx, k1, k2, k3, k4 = jax.random.split(key, 5)

    # Small shapes: batch=8, features=32, hidden=64, out=16, split_sizes=4.
    N, D_IN, D_H, D_OUT = 8, 32, 64, 16
    x = jax.random.normal(kx, (N, D_IN), dtype=jnp.float32)

    w1 = jax.random.normal(k1, (D_IN, D_H), dtype=jnp.float32) * 0.1
    b1 = jax.random.normal(k2, (D_H,), dtype=jnp.float32) * 0.1
    w2 = jax.random.normal(k3, (D_H, D_OUT), dtype=jnp.float32) * 0.1
    b2 = jax.random.normal(k4, (D_OUT,), dtype=jnp.float32) * 0.1

    pipe = ModelPipelinePallas()
    pipe.append(w1, b1, gpu_id="0")
    pipe.append(w2, b2, gpu_id="1")

    def ref_stage(t, w, b):
        return jnp.maximum(t @ w + b[None, :], 0.0)

    ref = ref_stage(ref_stage(x, w1, b1), w2, b2)

    # ---- forward(x, split_sizes), exact f32 MXU path ----
    out = jax.block_until_ready(pipe.forward(x, split_sizes=4))
    assert out.shape == (N, D_OUT)
    assert jnp.allclose(out, ref, atol=1e-5, rtol=1e-5)

    # ---- forward, bf16 MXU inputs (f32 accumulation), loose tolerance ----
    out_bf16 = jax.block_until_ready(
        pipe.forward(x, split_sizes=4, mxu_dtype=jnp.bfloat16))
    assert out_bf16.shape == (N, D_OUT)
    assert jnp.allclose(out_bf16, ref, atol=5e-2, rtol=5e-2)

    # ---- constant_forward, stateless fast path (single pipeline pass) ----
    T = 3
    out_sum = jax.block_until_ready(pipe.constant_forward(x, T, reduce=True))
    out_cat = jax.block_until_ready(pipe.constant_forward(x, T, reduce=False))
    assert out_sum.shape == (N, D_OUT)
    assert jnp.allclose(out_sum, T * ref, atol=1e-4, rtol=1e-5)
    assert out_cat.shape == (T * N, D_OUT)
    assert jnp.allclose(out_cat, jnp.concatenate([ref] * T, axis=0),
                        atol=1e-5, rtol=1e-5)

    # ---- constant_forward, stateful-safe fallback (T genuine passes) ----
    out_sum2 = jax.block_until_ready(
        pipe.constant_forward(x, T, reduce=True, stateless=False))
    out_cat2 = jax.block_until_ready(
        pipe.constant_forward(x, T, reduce=False, stateless=False))
    assert jnp.allclose(out_sum2, T * ref, atol=1e-4, rtol=1e-5)
    assert jnp.allclose(out_cat2, jnp.concatenate([ref] * T, axis=0),
                        atol=1e-5, rtol=1e-5)

    print("KERNEL_OK")
</pallas_src>

<mosaic_0001>
module attributes {stable_mosaic.version = 11 : i64} {
  func.func @kernel(%arg0: i32, %arg1: memref<8x128xf32, #tpu.memory_space<vmem>>, %arg2: memref<128x128xf32, #tpu.memory_space<vmem>>, %arg3: memref<1x128xf32, #tpu.memory_space<vmem>>, %arg4: memref<128x128xf32, #tpu.memory_space<vmem>>, %arg5: memref<1x128xf32, #tpu.memory_space<vmem>>, %arg6: memref<8x128xf32, #tpu.memory_space<vmem>>) attributes {dimension_semantics = [#tpu.dimension_semantics<parallel>], iteration_bounds = array<i64: 1>, scalar_prefetch = 0 : i64, scratch_operands = 0 : i64, tpu.core_type = #tpu.core_type<tc>, window_params = [{transform_indices = @transform_0, window_bounds = array<i64: 8, 128>}, {pipeline_mode = #tpu.pipeline_mode<synchronous>, transform_indices = @transform_1, window_bounds = array<i64: 128, 128>}, {pipeline_mode = #tpu.pipeline_mode<synchronous>, transform_indices = @transform_2, window_bounds = array<i64: 1, 128>}, {pipeline_mode = #tpu.pipeline_mode<synchronous>, transform_indices = @transform_3, window_bounds = array<i64: 128, 128>}, {pipeline_mode = #tpu.pipeline_mode<synchronous>, transform_indices = @transform_4, window_bounds = array<i64: 1, 128>}, {transform_indices = @transform_5, window_bounds = array<i64: 8, 128>}]} {
    %c0 = arith.constant 0 : index
    %c0_0 = arith.constant 0 : index
    %0 = vector.load %arg1[%c0, %c0_0] : memref<8x128xf32, #tpu.memory_space<vmem>>, vector<8x128xf32>
    %c0_1 = arith.constant 0 : index
    %c0_2 = arith.constant 0 : index
    %1 = vector.load %arg2[%c0_1, %c0_2] : memref<128x128xf32, #tpu.memory_space<vmem>>, vector<128x128xf32>
    %c0_3 = arith.constant 0 : index
    %c0_4 = arith.constant 0 : index
    %2 = vector.load %arg3[%c0_3, %c0_4] : memref<1x128xf32, #tpu.memory_space<vmem>>, vector<1x128xf32>
    %cst = arith.constant dense<0.000000e+00> : vector<8x128xf32>
    %3 = tpu.matmul %0, %1, %cst {dimension_numbers = #tpu.dot_dimension_numbers<[1], [0], [0], [1], [0, 0, 1, 1], [], []>} : vector<8x128xf32>, vector<128x128xf32>, vector<8x128xf32> -> vector<8x128xf32>
    %4 = vector.broadcast %2 : vector<1x128xf32> to vector<8x128xf32>
    %5 = arith.addf %3, %4 : vector<8x128xf32>
    %cst_5 = arith.constant 0.000000e+00 : f32
    %6 = vector.broadcast %cst_5 : f32 to vector<8x128xf32>
    %7 = arith.maximumf %5, %6 : vector<8x128xf32>
    %c0_6 = arith.constant 0 : index
    %c0_7 = arith.constant 0 : index
    %8 = vector.load %arg4[%c0_6, %c0_7] : memref<128x128xf32, #tpu.memory_space<vmem>>, vector<128x128xf32>
    %c0_8 = arith.constant 0 : index
    %c0_9 = arith.constant 0 : index
    %9 = vector.load %arg5[%c0_8, %c0_9] : memref<1x128xf32, #tpu.memory_space<vmem>>, vector<1x128xf32>
    %cst_10 = arith.constant dense<0.000000e+00> : vector<8x128xf32>
    %10 = tpu.matmul %7, %8, %cst_10 {dimension_numbers = #tpu.dot_dimension_numbers<[1], [0], [0], [1], [0, 0, 1, 1], [], []>} : vector<8x128xf32>, vector<128x128xf32>, vector<8x128xf32> -> vector<8x128xf32>
    %11 = vector.broadcast %9 : vector<1x128xf32> to vector<8x128xf32>
    %12 = arith.addf %10, %11 : vector<8x128xf32>
    %cst_11 = arith.constant 0.000000e+00 : f32
    %13 = vector.broadcast %cst_11 : f32 to vector<8x128xf32>
    %14 = arith.maximumf %12, %13 : vector<8x128xf32>
    %c0_12 = arith.constant 0 : index
    %c0_13 = arith.constant 0 : index
    %15 = vector.load %arg6[%c0_12, %c0_13] : memref<8x128xf32, #tpu.memory_space<vmem>>, vector<8x128xf32>
    tpu.vector_store %arg6[%c0_12, %c0_13], %14 {strides = array<i32>} : memref<8x128xf32, #tpu.memory_space<vmem>>, vector<8x128xf32>,
    return
  }
  func.func @transform_0(%arg0: i32) -> (i32, i32) {
    %c0_i32 = arith.constant 0 : i32
    %c0_i32_0 = arith.constant 0 : i32
    return %arg0, %c0_i32 : i32, i32
  }
  func.func @transform_1(%arg0: i32) -> (i32, i32) {
    %c0_i32 = arith.constant 0 : i32
    %c0_i32_0 = arith.constant 0 : i32
    %c0_i32_1 = arith.constant 0 : i32
    return %c0_i32, %c0_i32_0 : i32, i32
  }
  func.func @transform_2(%arg0: i32) -> (i32, i32) {
    %c0_i32 = arith.constant 0 : i32
    %c0_i32_0 = arith.constant 0 : i32
    %c0_i32_1 = arith.constant 0 : i32
    return %c0_i32, %c0_i32_0 : i32, i32
  }
  func.func @transform_3(%arg0: i32) -> (i32, i32) {
    %c0_i32 = arith.constant 0 : i32
    %c0_i32_0 = arith.constant 0 : i32
    %c0_i32_1 = arith.constant 0 : i32
    return %c0_i32, %c0_i32_0 : i32, i32
  }
  func.func @transform_4(%arg0: i32) -> (i32, i32) {
    %c0_i32 = arith.constant 0 : i32
    %c0_i32_0 = arith.constant 0 : i32
    %c0_i32_1 = arith.constant 0 : i32
    return %c0_i32, %c0_i32_0 : i32, i32
  }
  func.func @transform_5(%arg0: i32) -> (i32, i32) {
    %c0_i32 = arith.constant 0 : i32
    %c0_i32_0 = arith.constant 0 : i32
    return %arg0, %c0_i32 : i32, i32
  }
}

module attributes {stable_mosaic.version = 11 : i64} {
  func.func @kernel(%arg0: i32, %arg1: memref<8x128xf32, #tpu.memory_space<vmem>>, %arg2: memref<128x128xf32, #tpu.memory_space<vmem>>, %arg3: memref<1x128xf32, #tpu.memory_space<vmem>>, %arg4: memref<128x128xf32, #tpu.memory_space<vmem>>, %arg5: memref<1x128xf32, #tpu.memory_space<vmem>>, %arg6: memref<8x128xf32, #tpu.memory_space<vmem>>) attributes {dimension_semantics = [#tpu.dimension_semantics<parallel>], iteration_bounds = array<i64: 1>, scalar_prefetch = 0 : i64, scratch_operands = 0 : i64, tpu.core_type = #tpu.core_type<tc>, window_params = [{transform_indices = @transform_0, window_bounds = array<i64: 8, 128>}, {pipeline_mode = #tpu.pipeline_mode<synchronous>, transform_indices = @transform_1, window_bounds = array<i64: 128, 128>}, {pipeline_mode = #tpu.pipeline_mode<synchronous>, transform_indices = @transform_2, window_bounds = array<i64: 1, 128>}, {pipeline_mode = #tpu.pipeline_mode<synchronous>, transform_indices = @transform_3, window_bounds = array<i64: 128, 128>}, {pipeline_mode = #tpu.pipeline_mode<synchronous>, transform_indices = @transform_4, window_bounds = array<i64: 1, 128>}, {transform_indices = @transform_5, window_bounds = array<i64: 8, 128>}]} {
    %c0 = arith.constant 0 : index
    %c0_0 = arith.constant 0 : index
    %0 = vector.load %arg1[%c0, %c0_0] : memref<8x128xf32, #tpu.memory_space<vmem>>, vector<8x128xf32>
    %c0_1 = arith.constant 0 : index
    %c0_2 = arith.constant 0 : index
    %1 = vector.load %arg2[%c0_1, %c0_2] : memref<128x128xf32, #tpu.memory_space<vmem>>, vector<128x128xf32>
    %c0_3 = arith.constant 0 : index
    %c0_4 = arith.constant 0 : index
    %2 = vector.load %arg3[%c0_3, %c0_4] : memref<1x128xf32, #tpu.memory_space<vmem>>, vector<1x128xf32>
    %cst = arith.constant dense<0.000000e+00> : vector<8x128xf32>
    %3 = tpu.matmul %0, %1, %cst {dimension_numbers = #tpu.dot_dimension_numbers<[1], [0], [0], [1], [0, 0, 1, 1], [], []>} : vector<8x128xf32>, vector<128x128xf32>, vector<8x128xf32> -> vector<8x128xf32>
    %4 = vector.broadcast %2 : vector<1x128xf32> to vector<8x128xf32>
    %5 = arith.addf %3, %4 : vector<8x128xf32>
    %cst_5 = arith.constant 0.000000e+00 : f32
    %6 = vector.broadcast %cst_5 : f32 to vector<8x128xf32>
    %7 = arith.maximumf %5, %6 : vector<8x128xf32>
    %c0_6 = arith.constant 0 : index
    %c0_7 = arith.constant 0 : index
    %8 = vector.load %arg4[%c0_6, %c0_7] : memref<128x128xf32, #tpu.memory_space<vmem>>, vector<128x128xf32>
    %c0_8 = arith.constant 0 : index
    %c0_9 = arith.constant 0 : index
    %9 = vector.load %arg5[%c0_8, %c0_9] : memref<1x128xf32, #tpu.memory_space<vmem>>, vector<1x128xf32>
    %cst_10 = arith.constant dense<0.000000e+00> : vector<8x128xf32>
    %10 = tpu.matmul %7, %8, %cst_10 {dimension_numbers = #tpu.dot_dimension_numbers<[1], [0], [0], [1], [0, 0, 1, 1], [], []>} : vector<8x128xf32>, vector<128x128xf32>, vector<8x128xf32> -> vector<8x128xf32>
    %11 = vector.broadcast %9 : vector<1x128xf32> to vector<8x128xf32>
    %12 = arith.addf %10, %11 : vector<8x128xf32>
    %cst_11 = arith.constant 0.000000e+00 : f32
    %13 = vector.broadcast %cst_11 : f32 to vector<8x128xf32>
    %14 = arith.maximumf %12, %13 : vector<8x128xf32>
    %c0_12 = arith.constant 0 : index
    %c0_13 = arith.constant 0 : index
    %15 = vector.load %arg6[%c0_12, %c0_13] : memref<8x128xf32, #tpu.memory_space<vmem>>, vector<8x128xf32>
    tpu.vector_store %arg6[%c0_12, %c0_13], %14 {strides = array<i32>} : memref<8x128xf32, #tpu.memory_space<vmem>>, vector<8x128xf32>,
    return
  }
  func.func @transform_0(%arg0: i32) -> (i32, i32) {
    %c0_i32 = arith.constant 0 : i32
    %c0_i32_0 = arith.constant 0 : i32
    return %arg0, %c0_i32 : i32, i32
  }
  func.func @transform_1(%arg0: i32) -> (i32, i32) {
    %c0_i32 = arith.constant 0 : i32
    %c0_i32_0 = arith.constant 0 : i32
    %c0_i32_1 = arith.constant 0 : i32
    return %c0_i32, %c0_i32_0 : i32, i32
  }
  func.func @transform_2(%arg0: i32) -> (i32, i32) {
    %c0_i32 = arith.constant 0 : i32
    %c0_i32_0 = arith.constant 0 : i32
    %c0_i32_1 = arith.constant 0 : i32
    return %c0_i32, %c0_i32_0 : i32, i32
  }
  func.func @transform_3(%arg0: i32) -> (i32, i32) {
    %c0_i32 = arith.constant 0 : i32
    %c0_i32_0 = arith.constant 0 : i32
    %c0_i32_1 = arith.constant 0 : i32
    return %c0_i32, %c0_i32_0 : i32, i32
  }
  func.func @transform_4(%arg0: i32) -> (i32, i32) {
    %c0_i32 = arith.constant 0 : i32
    %c0_i32_0 = arith.constant 0 : i32
    %c0_i32_1 = arith.constant 0 : i32
    return %c0_i32, %c0_i32_0 : i32, i32
  }
  func.func @transform_5(%arg0: i32) -> (i32, i32) {
    %c0_i32 = arith.constant 0 : i32
    %c0_i32_0 = arith.constant 0 : i32
    return %arg0, %c0_i32 : i32, i32
  }
}

</mosaic_0001>

<bundles_post_ra>
// kernel: tpu_custom_call.1
= control target key start
LH: loop header
LB: loop body
LE: loop exit
PB: predicated region body
PF: predicated region fallthrough
CT: control target
= control target key end

     0   :  { %10 = vsyncpa [#allocation3], 0  ;;  %s556_s0 = inlined_call_operand.hbm [shape: f32[8,128], index: 0, kind: input, shape index: {}]   ;;  %s557_s1 = inlined_call_operand.hbm [shape: f32[128,128], index: 1, kind: input, shape index: {}]   ;;  %s558_s2 = inlined_call_operand.vmem [shape: f32[1,128], index: 2, kind: input, shape index: {}]   ;;  %s559_s3 = inlined_call_operand.hbm [shape: f32[128,128], index: 3, kind: input, shape index: {}]   ;;  %s560_s4 = inlined_call_operand.vmem [shape: f32[1,128], index: 4, kind: input, shape index: {}]   ;;  %s561_s5 = inlined_call_operand.hbm [shape: f32[8,128], index: 5, kind: output, shape index: {}]  }
   0x1   :  { %11 = vsyncpa [#allocation6], 0 }
   0x2   :  { %12 = vsyncpa [#allocation4], 0  ;;  %s466_s18 = smov [#allocation5]  }
   0x3   :  { %s28_s19 = sshll.u32 %s466_s18, 4  ;;  %s29_s19 = int_to_ptr.vmem [resolvable:$true] %s28_s19 }
   0x4   :  { %s388_s20 = scalar_lea.vmem %s29_s19, 2048  ;;  %p393_p1 = scmp.lt.s32.totalorder %s29_s19, %s29_s19 }
   0x5   :  { %p389_p0 = scmp.ne.s32.totalorder %s29_s19, %s388_s20  ;;  %p394_p2 = scmp.lt.s32.totalorder %s388_s20, %s388_s20 }
   0x7   :  { %p395_p3 = por %p394_p2, %p393_p1 }
   0x9   :  { %p396_p4 = pnand %p395_p3, %p389_p0 }
   0xb   :  { %399 = shalt.err (!%p396_p4)
}
   0xc   :  { %s467_s21 = smov 128   ;;  %s468_s22 = smov 8  }
   0xd   :  { %34 = dma.hbm_to_vmem [thread:$0]  %s557_s1, 2048, %s29_s19, [#allocation6], %s467_s21, %s467_s21, %s468_s22  }
   0xe   :  { %s469_s25 = smov [#allocation2]   ;;  %s470_s27 = smov [#allocation7]  }
   0xf   :  { %s19_s26 = sshll.u32 %s469_s25, 4  ;;  %s42_s28 = sshll.u32 %s470_s27, 4  ;;  %s20_s26 = int_to_ptr.vmem [resolvable:$true] %s19_s26  ;;  %s43_s28 = int_to_ptr.vmem [resolvable:$true] %s42_s28 }
  0x10   :  { %s408_s29 = scalar_lea.vmem %s20_s26, 128  ;;  %p413_p6 = scmp.lt.s32.totalorder %s20_s26, %s20_s26 }
  0x11   :  { %p409_p5 = scmp.ne.s32.totalorder %s20_s26, %s408_s29  ;;  %p414_p7 = scmp.lt.s32.totalorder %s408_s29, %s408_s29 }
  0x13   :  { %p415_p8 = por %p414_p7, %p413_p6 }
  0x15   :  { %p416_p9 = pnand %p415_p8, %p409_p5 }
  0x17   :  { %419 = shalt.err (!%p416_p9)
}
  0x18   :  { %22 = dma.hbm_to_vmem [thread:$0]  %s556_s0, 128, %s20_s26, [#allocation3]  }
  0x19   :  { %s428_s7 = scalar_lea.vmem %s43_s28, 2048  ;;  %p433_p11 = scmp.lt.s32.totalorder %s43_s28, %s43_s28 }
  0x1a   :  { %p429_p10 = scmp.ne.s32.totalorder %s43_s28, %s428_s7  ;;  %p434_p12 = scmp.lt.s32.totalorder %s428_s7, %s428_s7 }
  0x1c   :  { %p435_p13 = por %p434_p12, %p433_p11 }
  0x1e   :  { %p436_p0 = pnand %p435_p13, %p429_p10 }
  0x20   :  { %439 = shalt.err (!%p436_p0)
}
  0x21   :  { %48 = dma.hbm_to_vmem [thread:$0]  %s559_s3, 2048, %s43_s28, [#allocation6], %s467_s21, %s467_s21, %s468_s22  }
  0x22   :  { %460 = dma.done.wait [#allocation3], 128  }
  0x23   :  { %461 = vsyncadd [#allocation3], 4294967168 }
  0x24   :  { %462 = dma.done.wait [#allocation6], 4096  }
  0x25   :  { %463 = vsyncadd [#allocation6], 4294963200  ;;  %v471_v0 = vmov 0.0   ;;  %vm472_vm0 = vmmov 0   ;;  %v76_v1 = vld [vmem:[#allocation5 + $0x78] sm:$0xff]  ;;  %v75_v2 = vld [vmem:[#allocation5 + $0x70] sm:$0xff] }
  0x26   :  { %302 = vmatprep.subr.mxu0 %v471_v0  ;;  %334 = vmatprep.mubr.msk.f32.mxu0 %vm472_vm0, %v471_v0  ;;  %v74_v3 = vld [vmem:[#allocation5 + $0x68] sm:$0xff]  ;;  %v73_v4 = vld [vmem:[#allocation5 + $0x60] sm:$0xff]  ;;  %v170_v5 = vld [vmem:[#allocation7 + $0x78] sm:$0xff]  ;;  %s473_s11 = smov [#allocation8]  }
  0x27   :  { %337 = vmatprep.subr.mxu1 %v471_v0  ;;  %369 = vmatprep.mubr.msk.f32.mxu1 %vm472_vm0, %v471_v0  ;;  %v72_v6 = vld [vmem:[#allocation5 + $0x58] sm:$0xff]  ;;  %v169_v7 = vld [vmem:[#allocation7 + $0x70] sm:$0xff]  ;;  %v168_v8 = vld [vmem:[#allocation7 + $0x68] sm:$0xff]  ;;  %s256_s12 = sshll.u32 %s473_s11, 4  ;;  %s257_s12 = int_to_ptr.vmem [resolvable:$true] %s256_s12 }
  0x28   :  { %303 = vmatpush3.msra.mxu0 %v76_v1  ;;  %338 = vmatpush3.msra.mxu1 %v170_v5  ;;  %v71_v9 = vld [vmem:[#allocation5 + $0x50] sm:$0xff]  ;;  %v167_v10 = vld [vmem:[#allocation7 + $0x60] sm:$0xff]  ;;  %v70_v11 = vld [vmem:[#allocation5 + $0x48] sm:$0xff]  ;;  %s440_s13 = scalar_lea.vmem %s257_s12, 128  ;;  %p445_p2 = scmp.lt.s32.totalorder %s257_s12, %s257_s12 }
  0x29   :  { %304 = vmatprep.subr.mxu0 %v471_v0  ;;  %339 = vmatprep.subr.mxu1 %v471_v0  ;;  %v166_v12 = vld [vmem:[#allocation7 + $0x58] sm:$0xff]  ;;  %v69_v13 = vld [vmem:[#allocation5 + $0x40] sm:$0xff]  ;;  %v165_v14 = vld [vmem:[#allocation7 + $0x50] sm:$0xff]  ;;  %p441_p1 = scmp.ne.s32.totalorder %s257_s12, %s440_s13  ;;  %p446_p3 = scmp.lt.s32.totalorder %s440_s13, %s440_s13 }
  0x2a   :  { %305 = vmatpush3.msra.mxu0 %v75_v2  ;;  %340 = vmatpush3.msra.mxu1 %v169_v7  ;;  %v68_v15 = vld [vmem:[#allocation5 + $0x38] sm:$0xff]  ;;  %v164_v16 = vld [vmem:[#allocation7 + $0x48] sm:$0xff]  ;;  %v67_v17 = vld [vmem:[#allocation5 + $0x30] sm:$0xff] }
  0x2b   :  { %306 = vmatprep.subr.mxu0 %v471_v0  ;;  %341 = vmatprep.subr.mxu1 %v471_v0  ;;  %v163_v18 = vld [vmem:[#allocation7 + $0x40] sm:$0xff]  ;;  %v66_v19 = vld [vmem:[#allocation5 + $0x28] sm:$0xff]  ;;  %v162_v20 = vld [vmem:[#allocation7 + $0x38] sm:$0xff]  ;;  %p447_p4 = por %p446_p3, %p445_p2 }
  0x2c   :  { %307 = vmatpush3.msra.mxu0 %v74_v3  ;;  %342 = vmatpush3.msra.mxu1 %v168_v8  ;;  %v65_v21 = vld [vmem:[#allocation5 + $0x20] sm:$0xff]  ;;  %v161_v22 = vld [vmem:[#allocation7 + $0x30] sm:$0xff]  ;;  %v64_v23 = vld [vmem:[#allocation5 + $0x18] sm:$0xff] }
  0x2d   :  { %308 = vmatprep.subr.mxu0 %v471_v0  ;;  %343 = vmatprep.subr.mxu1 %v471_v0  ;;  %v160_v24 = vld [vmem:[#allocation7 + $0x28] sm:$0xff]  ;;  %v63_v25 = vld [vmem:[#allocation5 + $0x10] sm:$0xff]  ;;  %v159_v26 = vld [vmem:[#allocation7 + $0x20] sm:$0xff]  ;;  %p448_p5 = pnand %p447_p4, %p441_p1 }
  0x2e   :  { %309 = vmatpush3.msra.mxu0 %v73_v4  ;;  %344 = vmatpush3.msra.mxu1 %v167_v10  ;;  %v62_v27 = vld [vmem:[#allocation5 + $0x8] sm:$0xff]  ;;  %v158_v28 = vld [vmem:[#allocation7 + $0x18] sm:$0xff]  ;;  %v61_v29 = vld [vmem:[#allocation5] sm:$0xff] }
  0x2f   :  { %310 = vmatprep.subr.mxu0 %v471_v0  ;;  %345 = vmatprep.subr.mxu1 %v471_v0  ;;  %v60_v30 = vld [vmem:[#allocation2] sm:$0xff]  ;;  %v157_v31 = vld [vmem:[#allocation7 + $0x10] sm:$0xff]  ;;  %v156_v32 = vld [vmem:[#allocation7 + $0x8] sm:$0xff] }
  0x30   :  { %311 = vmatpush3.msra.mxu0 %v72_v6  ;;  %346 = vmatpush3.msra.mxu1 %v166_v12  ;;  %v155_v33 = vld [vmem:[#allocation7] sm:$0xff]  ;;  %v266_v34 = vld [vmem:[%s558_s2] ss:$0 sm:$0xff] }
  0x31   :  { %312 = vmatprep.subr.mxu0 %v471_v0  ;;  %347 = vmatprep.subr.mxu1 %v471_v0  ;;  %v267_v39 = vld [vmem:[%s560_s4] ss:$0 sm:$0xff] }
  0x32   :  { %313 = vmatpush3.msra.mxu0 %v71_v9  ;;  %348 = vmatpush3.msra.mxu1 %v165_v14 }
  0x33   :  { %314 = vmatprep.subr.mxu0 %v471_v0  ;;  %349 = vmatprep.subr.mxu1 %v471_v0 }
  0x34   :  { %315 = vmatpush3.msra.mxu0 %v70_v11  ;;  %350 = vmatpush3.msra.mxu1 %v164_v16 }
  0x35   :  { %316 = vmatprep.subr.mxu0 %v471_v0  ;;  %351 = vmatprep.subr.mxu1 %v471_v0 }
  0x36   :  { %317 = vmatpush3.msra.mxu0 %v69_v13  ;;  %352 = vmatpush3.msra.mxu1 %v163_v18 }
  0x37   :  { %318 = vmatprep.subr.mxu0 %v471_v0  ;;  %353 = vmatprep.subr.mxu1 %v471_v0 }
  0x38   :  { %319 = vmatpush3.msra.mxu0 %v68_v15  ;;  %354 = vmatpush3.msra.mxu1 %v162_v20 }
  0x39   :  { %320 = vmatprep.subr.mxu0 %v471_v0  ;;  %355 = vmatprep.subr.mxu1 %v471_v0 }
  0x3a   :  { %321 = vmatpush3.msra.mxu0 %v67_v17  ;;  %356 = vmatpush3.msra.mxu1 %v161_v22 }
  0x3b   :  { %322 = vmatprep.subr.mxu0 %v471_v0  ;;  %357 = vmatprep.subr.mxu1 %v471_v0 }
  0x3c   :  { %323 = vmatpush3.msra.mxu0 %v66_v19  ;;  %358 = vmatpush3.msra.mxu1 %v160_v24 }
  0x3d   :  { %324 = vmatprep.subr.mxu0 %v471_v0  ;;  %359 = vmatprep.subr.mxu1 %v471_v0 }
  0x3e   :  { %325 = vmatpush3.msra.mxu0 %v65_v21  ;;  %360 = vmatpush3.msra.mxu1 %v159_v26 }
  0x3f   :  { %326 = vmatprep.subr.mxu0 %v471_v0  ;;  %361 = vmatprep.subr.mxu1 %v471_v0 }
  0x40   :  { %327 = vmatpush3.msra.mxu0 %v64_v23  ;;  %362 = vmatpush3.msra.mxu1 %v158_v28 }
  0x41   :  { %328 = vmatprep.subr.mxu0 %v471_v0  ;;  %363 = vmatprep.subr.mxu1 %v471_v0 }
  0x42   :  { %329 = vmatpush3.msra.mxu0 %v63_v25  ;;  %364 = vmatpush3.msra.mxu1 %v157_v31 }
  0x43   :  { %330 = vmatprep.subr.mxu0 %v471_v0  ;;  %365 = vmatprep.subr.mxu1 %v471_v0 }
  0x44   :  { %331 = vmatpush3.msra.mxu0 %v62_v27  ;;  %366 = vmatpush3.msra.mxu1 %v156_v32 }
  0x45   :  { %332 = vmatprep.subr.mxu0 %v471_v0  ;;  %367 = vmatprep.subr.mxu1 %v471_v0 }
  0x46   :  { %333 = vmatpush3.msra.mxu0 %v61_v29  ;;  %368 = vmatpush3.msra.mxu1 %v155_v33 }
  0x47   :  { %335 = vmatmul.mubr.f32.vlgmr.msra.gmra.mxu0 %v60_v30 }
 0x107   :  { %v150_v35 = vpop.f32.mrf.mxu0 }
 0x108   :  { %v151_v36 = vadd.f32 %v266_v34, %v150_v35 }
 0x109   :  { %v336_v37 = vpop.f32.mrf.mxu0 }
 0x10a   :  { %v154_v38 = vmax.f32 %v151_v36, 0.0 }
 0x10c   :  { %370 = vmatmul.mubr.f32.vlgmr.msra.gmra.mxu1 %v154_v38 }
 0x1cc   :  { %v244_v40 = vpop.f32.mrf.mxu1 }
 0x1cd   :  { %v245_v41 = vadd.f32 %v267_v39, %v244_v40 }
 0x1ce   :  { %v371_v42 = vpop.f32.mrf.mxu1 }
 0x1cf   :  { %v248_v43 = vmax.f32 %v245_v41, 0.0 }
 0x1d1   :  { %249 = vst [vmem:[#allocation8] sm:$0xff] %v248_v43 }
 0x1d2   :  { %451 = shalt.err (!%p448_p5)
}
 0x1d3   :  { %259 = dma.vmem_to_hbm [thread:$0]  %s257_s12, 128, %s561_s5, [#allocation4]  }
 0x1d4   :  { %464 = dma.done.wait [#allocation4], 128  }
 0x1d5   :  { %465 = vsyncadd [#allocation4], 4294967168 }
 0x1d6   :  { %263 = vsyncpa [#allocation3], 1 }
 0x1d7   :  { %264 = vsyncpa [#allocation6], 1 }
 0x1d8   :  { %265 = vsyncpa [#allocation4], 1 }

// kernel: tpu_custom_call.1
= control target key start
LH: loop header
LB: loop body
LE: loop exit
PB: predicated region body
PF: predicated region fallthrough
CT: control target
= control target key end

     0   :  { %10 = vsyncpa [#allocation3], 0  ;;  %s556_s0 = inlined_call_operand.hbm [shape: f32[8,128], index: 0, kind: input, shape index: {}]   ;;  %s557_s1 = inlined_call_operand.hbm [shape: f32[128,128], index: 1, kind: input, shape index: {}]   ;;  %s558_s2 = inlined_call_operand.vmem [shape: f32[1,128], index: 2, kind: input, shape index: {}]   ;;  %s559_s3 = inlined_call_operand.hbm [shape: f32[128,128], index: 3, kind: input, shape index: {}]   ;;  %s560_s4 = inlined_call_operand.vmem [shape: f32[1,128], index: 4, kind: input, shape index: {}]   ;;  %s561_s5 = inlined_call_operand.hbm [shape: f32[8,128], index: 5, kind: output, shape index: {}]  }
   0x1   :  { %11 = vsyncpa [#allocation6], 0 }
   0x2   :  { %12 = vsyncpa [#allocation4], 0  ;;  %s466_s18 = smov [#allocation5]  }
   0x3   :  { %s28_s19 = sshll.u32 %s466_s18, 4  ;;  %s29_s19 = int_to_ptr.vmem [resolvable:$true] %s28_s19 }
   0x4   :  { %s388_s20 = scalar_lea.vmem %s29_s19, 2048  ;;  %p393_p1 = scmp.lt.s32.totalorder %s29_s19, %s29_s19 }
   0x5   :  { %p389_p0 = scmp.ne.s32.totalorder %s29_s19, %s388_s20  ;;  %p394_p2 = scmp.lt.s32.totalorder %s388_s20, %s388_s20 }
   0x7   :  { %p395_p3 = por %p394_p2, %p393_p1 }
   0x9   :  { %p396_p4 = pnand %p395_p3, %p389_p0 }
   0xb   :  { %399 = shalt.err (!%p396_p4)
}
   0xc   :  { %s467_s21 = smov 128   ;;  %s468_s22 = smov 8  }
   0xd   :  { %34 = dma.hbm_to_vmem [thread:$0]  %s557_s1, 2048, %s29_s19, [#allocation6], %s467_s21, %s467_s21, %s468_s22  }
   0xe   :  { %s469_s25 = smov [#allocation2]   ;;  %s470_s27 = smov [#allocation7]  }
   0xf   :  { %s19_s26 = sshll.u32 %s469_s25, 4  ;;  %s42_s28 = sshll.u32 %s470_s27, 4  ;;  %s20_s26 = int_to_ptr.vmem [resolvable:$true] %s19_s26  ;;  %s43_s28 = int_to_ptr.vmem [resolvable:$true] %s42_s28 }
  0x10   :  { %s408_s29 = scalar_lea.vmem %s20_s26, 128  ;;  %p413_p6 = scmp.lt.s32.totalorder %s20_s26, %s20_s26 }
  0x11   :  { %p409_p5 = scmp.ne.s32.totalorder %s20_s26, %s408_s29  ;;  %p414_p7 = scmp.lt.s32.totalorder %s408_s29, %s408_s29 }
  0x13   :  { %p415_p8 = por %p414_p7, %p413_p6 }
  0x15   :  { %p416_p9 = pnand %p415_p8, %p409_p5 }
  0x17   :  { %419 = shalt.err (!%p416_p9)
}
  0x18   :  { %22 = dma.hbm_to_vmem [thread:$0]  %s556_s0, 128, %s20_s26, [#allocation3]  }
  0x19   :  { %s428_s7 = scalar_lea.vmem %s43_s28, 2048  ;;  %p433_p11 = scmp.lt.s32.totalorder %s43_s28, %s43_s28 }
  0x1a   :  { %p429_p10 = scmp.ne.s32.totalorder %s43_s28, %s428_s7  ;;  %p434_p12 = scmp.lt.s32.totalorder %s428_s7, %s428_s7 }
  0x1c   :  { %p435_p13 = por %p434_p12, %p433_p11 }
  0x1e   :  { %p436_p0 = pnand %p435_p13, %p429_p10 }
  0x20   :  { %439 = shalt.err (!%p436_p0)
}
  0x21   :  { %48 = dma.hbm_to_vmem [thread:$0]  %s559_s3, 2048, %s43_s28, [#allocation6], %s467_s21, %s467_s21, %s468_s22  }
  0x22   :  { %460 = dma.done.wait [#allocation3], 128  }
  0x23   :  { %461 = vsyncadd [#allocation3], 4294967168 }
  0x24   :  { %462 = dma.done.wait [#allocation6], 4096  }
  0x25   :  { %463 = vsyncadd [#allocation6], 4294963200  ;;  %v471_v0 = vmov 0.0   ;;  %vm472_vm0 = vmmov 0   ;;  %v76_v1 = vld [vmem:[#allocation5 + $0x78] sm:$0xff]  ;;  %v75_v2 = vld [vmem:[#allocation5 + $0x70] sm:$0xff] }
  0x26   :  { %302 = vmatprep.subr.mxu0 %v471_v0  ;;  %334 = vmatprep.mubr.msk.f32.mxu0 %vm472_vm0, %v471_v0  ;;  %v74_v3 = vld [vmem:[#allocation5 + $0x68] sm:$0xff]  ;;  %v73_v4 = vld [vmem:[#allocation5 + $0x60] sm:$0xff]  ;;  %v170_v5 = vld [vmem:[#allocation7 + $0x78] sm:$0xff]  ;;  %s473_s11 = smov [#allocation8]  }
  0x27   :  { %337 = vmatprep.subr.mxu1 %v471_v0  ;;  %369 = vmatprep.mubr.msk.f32.mxu1 %vm472_vm0, %v471_v0  ;;  %v72_v6 = vld [vmem:[#allocation5 + $0x58] sm:$0xff]  ;;  %v169_v7 = vld [vmem:[#allocation7 + $0x70] sm:$0xff]  ;;  %v168_v8 = vld [vmem:[#allocation7 + $0x68] sm:$0xff]  ;;  %s256_s12 = sshll.u32 %s473_s11, 4  ;;  %s257_s12 = int_to_ptr.vmem [resolvable:$true] %s256_s12 }
  0x28   :  { %303 = vmatpush3.msra.mxu0 %v76_v1  ;;  %338 = vmatpush3.msra.mxu1 %v170_v5  ;;  %v71_v9 = vld [vmem:[#allocation5 + $0x50] sm:$0xff]  ;;  %v167_v10 = vld [vmem:[#allocation7 + $0x60] sm:$0xff]  ;;  %v70_v11 = vld [vmem:[#allocation5 + $0x48] sm:$0xff]  ;;  %s440_s13 = scalar_lea.vmem %s257_s12, 128  ;;  %p445_p2 = scmp.lt.s32.totalorder %s257_s12, %s257_s12 }
  0x29   :  { %304 = vmatprep.subr.mxu0 %v471_v0  ;;  %339 = vmatprep.subr.mxu1 %v471_v0  ;;  %v166_v12 = vld [vmem:[#allocation7 + $0x58] sm:$0xff]  ;;  %v69_v13 = vld [vmem:[#allocation5 + $0x40] sm:$0xff]  ;;  %v165_v14 = vld [vmem:[#allocation7 + $0x50] sm:$0xff]  ;;  %p441_p1 = scmp.ne.s32.totalorder %s257_s12, %s440_s13  ;;  %p446_p3 = scmp.lt.s32.totalorder %s440_s13, %s440_s13 }
  0x2a   :  { %305 = vmatpush3.msra.mxu0 %v75_v2  ;;  %340 = vmatpush3.msra.mxu1 %v169_v7  ;;  %v68_v15 = vld [vmem:[#allocation5 + $0x38] sm:$0xff]  ;;  %v164_v16 = vld [vmem:[#allocation7 + $0x48] sm:$0xff]  ;;  %v67_v17 = vld [vmem:[#allocation5 + $0x30] sm:$0xff] }
  0x2b   :  { %306 = vmatprep.subr.mxu0 %v471_v0  ;;  %341 = vmatprep.subr.mxu1 %v471_v0  ;;  %v163_v18 = vld [vmem:[#allocation7 + $0x40] sm:$0xff]  ;;  %v66_v19 = vld [vmem:[#allocation5 + $0x28] sm:$0xff]  ;;  %v162_v20 = vld [vmem:[#allocation7 + $0x38] sm:$0xff]  ;;  %p447_p4 = por %p446_p3, %p445_p2 }
  0x2c   :  { %307 = vmatpush3.msra.mxu0 %v74_v3  ;;  %342 = vmatpush3.msra.mxu1 %v168_v8  ;;  %v65_v21 = vld [vmem:[#allocation5 + $0x20] sm:$0xff]  ;;  %v161_v22 = vld [vmem:[#allocation7 + $0x30] sm:$0xff]  ;;  %v64_v23 = vld [vmem:[#allocation5 + $0x18] sm:$0xff] }
  0x2d   :  { %308 = vmatprep.subr.mxu0 %v471_v0  ;;  %343 = vmatprep.subr.mxu1 %v471_v0  ;;  %v160_v24 = vld [vmem:[#allocation7 + $0x28] sm:$0xff]  ;;  %v63_v25 = vld [vmem:[#allocation5 + $0x10] sm:$0xff]  ;;  %v159_v26 = vld [vmem:[#allocation7 + $0x20] sm:$0xff]  ;;  %p448_p5 = pnand %p447_p4, %p441_p1 }
  0x2e   :  { %309 = vmatpush3.msra.mxu0 %v73_v4  ;;  %344 = vmatpush3.msra.mxu1 %v167_v10  ;;  %v62_v27 = vld [vmem:[#allocation5 + $0x8] sm:$0xff]  ;;  %v158_v28 = vld [vmem:[#allocation7 + $0x18] sm:$0xff]  ;;  %v61_v29 = vld [vmem:[#allocation5] sm:$0xff] }
  0x2f   :  { %310 = vmatprep.subr.mxu0 %v471_v0  ;;  %345 = vmatprep.subr.mxu1 %v471_v0  ;;  %v60_v30 = vld [vmem:[#allocation2] sm:$0xff]  ;;  %v157_v31 = vld [vmem:[#allocation7 + $0x10] sm:$0xff]  ;;  %v156_v32 = vld [vmem:[#allocation7 + $0x8] sm:$0xff] }
  0x30   :  { %311 = vmatpush3.msra.mxu0 %v72_v6  ;;  %346 = vmatpush3.msra.mxu1 %v166_v12  ;;  %v155_v33 = vld [vmem:[#allocation7] sm:$0xff]  ;;  %v266_v34 = vld [vmem:[%s558_s2] ss:$0 sm:$0xff] }
  0x31   :  { %312 = vmatprep.subr.mxu0 %v471_v0  ;;  %347 = vmatprep.subr.mxu1 %v471_v0  ;;  %v267_v39 = vld [vmem:[%s560_s4] ss:$0 sm:$0xff] }
  0x32   :  { %313 = vmatpush3.msra.mxu0 %v71_v9  ;;  %348 = vmatpush3.msra.mxu1 %v165_v14 }
  0x33   :  { %314 = vmatprep.subr.mxu0 %v471_v0  ;;  %349 = vmatprep.subr.mxu1 %v471_v0 }
  0x34   :  { %315 = vmatpush3.msra.mxu0 %v70_v11  ;;  %350 = vmatpush3.msra.mxu1 %v164_v16 }
  0x35   :  { %316 = vmatprep.subr.mxu0 %v471_v0  ;;  %351 = vmatprep.subr.mxu1 %v471_v0 }
  0x36   :  { %317 = vmatpush3.msra.mxu0 %v69_v13  ;;  %352 = vmatpush3.msra.mxu1 %v163_v18 }
  0x37   :  { %318 = vmatprep.subr.mxu0 %v471_v0  ;;  %353 = vmatprep.subr.mxu1 %v471_v0 }
  0x38   :  { %319 = vmatpush3.msra.mxu0 %v68_v15  ;;  %354 = vmatpush3.msra.mxu1 %v162_v20 }
  0x39   :  { %320 = vmatprep.subr.mxu0 %v471_v0  ;;  %355 = vmatprep.subr.mxu1 %v471_v0 }
  0x3a   :  { %321 = vmatpush3.msra.mxu0 %v67_v17  ;;  %356 = vmatpush3.msra.mxu1 %v161_v22 }
  0x3b   :  { %322 = vmatprep.subr.mxu0 %v471_v0  ;;  %357 = vmatprep.subr.mxu1 %v471_v0 }
  0x3c   :  { %323 = vmatpush3.msra.mxu0 %v66_v19  ;;  %358 = vmatpush3.msra.mxu1 %v160_v24 }
  0x3d   :  { %324 = vmatprep.subr.mxu0 %v471_v0  ;;  %359 = vmatprep.subr.mxu1 %v471_v0 }
  0x3e   :  { %325 = vmatpush3.msra.mxu0 %v65_v21  ;;  %360 = vmatpush3.msra.mxu1 %v159_v26 }
  0x3f   :  { %326 = vmatprep.subr.mxu0 %v471_v0  ;;  %361 = vmatprep.subr.mxu1 %v471_v0 }
  0x40   :  { %327 = vmatpush3.msra.mxu0 %v64_v23  ;;  %362 = vmatpush3.msra.mxu1 %v158_v28 }
  0x41   :  { %328 = vmatprep.subr.mxu0 %v471_v0  ;;  %363 = vmatprep.subr.mxu1 %v471_v0 }
  0x42   :  { %329 = vmatpush3.msra.mxu0 %v63_v25  ;;  %364 = vmatpush3.msra.mxu1 %v157_v31 }
  0x43   :  { %330 = vmatprep.subr.mxu0 %v471_v0  ;;  %365 = vmatprep.subr.mxu1 %v471_v0 }
  0x44   :  { %331 = vmatpush3.msra.mxu0 %v62_v27  ;;  %366 = vmatpush3.msra.mxu1 %v156_v32 }
  0x45   :  { %332 = vmatprep.subr.mxu0 %v471_v0  ;;  %367 = vmatprep.subr.mxu1 %v471_v0 }
  0x46   :  { %333 = vmatpush3.msra.mxu0 %v61_v29  ;;  %368 = vmatpush3.msra.mxu1 %v155_v33 }
  0x47   :  { %335 = vmatmul.mubr.f32.vlgmr.msra.gmra.mxu0 %v60_v30 }
 0x107   :  { %v150_v35 = vpop.f32.mrf.mxu0 }
 0x108   :  { %v151_v36 = vadd.f32 %v266_v34, %v150_v35 }
 0x109   :  { %v336_v37 = vpop.f32.mrf.mxu0 }
 0x10a   :  { %v154_v38 = vmax.f32 %v151_v36, 0.0 }
 0x10c   :  { %370 = vmatmul.mubr.f32.vlgmr.msra.gmra.mxu1 %v154_v38 }
 0x1cc   :  { %v244_v40 = vpop.f32.mrf.mxu1 }
 0x1cd   :  { %v245_v41 = vadd.f32 %v267_v39, %v244_v40 }
 0x1ce   :  { %v371_v42 = vpop.f32.mrf.mxu1 }
 0x1cf   :  { %v248_v43 = vmax.f32 %v245_v41, 0.0 }
 0x1d1   :  { %249 = vst [vmem:[#allocation8] sm:$0xff] %v248_v43 }
 0x1d2   :  { %451 = shalt.err (!%p448_p5)
}
 0x1d3   :  { %259 = dma.vmem_to_hbm [thread:$0]  %s257_s12, 128, %s561_s5, [#allocation4]  }
 0x1d4   :  { %464 = dma.done.wait [#allocation4], 128  }
 0x1d5   :  { %465 = vsyncadd [#allocation4], 4294967168 }
 0x1d6   :  { %263 = vsyncpa [#allocation3], 1 }
 0x1d7   :  { %264 = vsyncpa [#allocation6], 1 }
 0x1d8   :  { %265 = vsyncpa [#allocation4], 1 }

</bundles_post_ra>
